<compile_context>
chip_gen: v6e
topology: v6e:2x2x1
jax: 0.10.0
libtpu: 0.0.40
codegen_flags: <defaults>
</compile_context>

<pallas_src>
import jax
import jax.numpy as jnp
from jax.experimental import pallas as pl
from jax.experimental.pallas import tpu as pltpu


def attention_kernel(q_ref, k_ref, w1t_ref, b1_ref, w2t_ref, b2_ref, v_ref,
                     bv_ref, ctx_ref, wts_ref, q1_s, w_s):
    """One batch block of TB elements.

    q_ref: (TB, H)   k_ref: (TB, S, H)   w1t/w2t: (H, H) pre-transposed
    b1/b2: (1, H)    v: (1, 1, H)        bv: (1, 1, 1)
    ctx_ref: (TB, H) wts_ref: (TB, S)    q1_s: VMEM (TB,1,H)  w_s: VMEM (TB,1,S)
    """
    tb, seq, h = k_ref.shape

    # ---- projections: two large 2-D MXU matmuls (M = TB and M = TB*S) ----
    q1 = jnp.dot(q_ref[...], w1t_ref[...],
                 preferred_element_type=jnp.float32) + b1_ref[...]         # (TB, H)

    k3 = k_ref[...]                                                        # (TB, S, H)
    kp = jnp.dot(k3.reshape(tb * seq, h), w2t_ref[...],
                 preferred_element_type=jnp.float32) + b2_ref[...]         # (TB*S, H)
    kp = kp.reshape(tb, seq, h)                                            # (TB, S, H)

    # ---- tanh(W1(q) + W2(k)): bridge q1 to (TB,1,H) via a tiny VMEM scratch,
    #      the add broadcasts it over S (sublane stretch) ----
    q1_s[:, 0, :] = q1
    t = jnp.tanh(q1_s[...] + kp)                                           # (TB, S, H)

    # ---- scores = V(t): batched einsum, no transposes, lane-dense S ----
    v3 = jnp.broadcast_to(v_ref[...], (tb, 1, h))                          # (TB, 1, H)
    scores = jnp.einsum("bqh,bsh->bqs", v3, t,
                        preferred_element_type=jnp.float32) + bv_ref[...]  # (TB, 1, S)

    # ---- softmax over S (lane axis); EUP approximate reciprocal ----
    m = jnp.max(scores, axis=-1, keepdims=True)
    e = jnp.exp(scores - m)
    denom = jnp.sum(e, axis=-1, keepdims=True)
    weights = e * pl.reciprocal(denom, approx=True)                        # (TB, 1, S)

    # ---- context = weights @ keys, batched over the block (flash pattern) ----
    ctx = jnp.einsum("bqs,bsh->bqh", weights.astype(k3.dtype), k3,
                     preferred_element_type=jnp.float32)                   # (TB, 1, H)

    # ---- write dense (TB, S) / (TB, H) slabs via the scratch rank-bridges
    #      (q1_s is dead here and reused for the context bridge) ----
    w_s[...] = weights
    wts_ref[...] = w_s[:, 0, :].astype(wts_ref.dtype)
    q1_s[...] = ctx
    ctx_ref[...] = q1_s[:, 0, :].astype(ctx_ref.dtype)


def _choose_block_b(B, S, H, itemsize=4, vmem_budget_bytes=32 << 20):
    """Largest batch block that divides B, keeps 2-D block second-minor dims
    sublane-aligned (x8) and fits a conservative VMEM budget (v7x-safe)."""
    # Per-batch-element VMEM: double-buffered keys/query/output blocks plus
    # the (TB, S, H) in-kernel temporaries (kp, tanh) and scratch bridges.
    per_b = itemsize * (4 * S * H + 4 * H + 2 * S)
    cap = min(512, max(1, vmem_budget_bytes // max(per_b, 1)))
    if B >= 16:                       # prefer >=2 grid steps: v7x has 2 TCs
        cap = min(cap, B // 2)
    tb = min(B, cap)
    if tb < B:
        tb -= tb % 8                  # sublane alignment for (TB, ...) blocks
        while tb >= 8 and B % tb != 0:
            tb -= 8
        if tb < 8:
            tb = B                    # tiny/odd batch: one block == full array
    return max(tb, 1)


def bahdanau_attention(query, keys, w1, b1, w2, b2, v, bv, *, block_b=None):
    B, Q, H = query.shape
    _, S, _ = keys.shape
    assert Q == 1

    itemsize = jnp.dtype(query.dtype).itemsize
    if block_b is None:
        block_b = _choose_block_b(B, S, H, itemsize)
    assert B % block_b == 0, (B, block_b)
    grid = (B // block_b,)

    # One-time layout plumbing (XLA, outside the grid loop): 2-D query slab,
    # pre-transposed W1/W2, biases/V presented as VMEM-friendly tiles.
    q2d = query.reshape(B, H)
    w1t = w1.T
    w2t = w2.T
    b1_2d = b1.reshape(1, H)
    b2_2d = b2.reshape(1, H)
    v_3d = v.reshape(1, 1, H)
    bv_3d = bv.reshape(1, 1, 1)

    # VMEM budget for the chosen tiles (pipeline double-buffers each spec) plus
    # in-kernel temporaries; clamped so it is valid on v5e/v6e and v7x (64 MiB).
    need = itemsize * (
        2 * block_b * (S * H + H)        # keys + query blocks (2 buffers)
        + 2 * block_b * (H + S)          # context + weights blocks (2 buffers)
        + 2 * 2 * H * H                  # W1^T, W2^T (2 buffers each)
        + 2 * (3 * H + 1)                # b1, b2, V, bV
        + 4 * block_b * S * H            # kp / tanh temporaries + scratch
    )
    vmem_limit = int(min(max(2 * need, 32 << 20), 64 << 20))

    # Advisory cost estimate so XLA's scheduler sees the work inside the call.
    flops = 2 * B * H * H + 2 * B * S * H * H + 4 * B * S * H
    transcendentals = B * S * H + B * S
    bytes_accessed = itemsize * (
        B * H + B * S * H            # query, keys in
        + 2 * H * H + 2 * H + H + 1  # weights / biases
        + B * H + B * S              # context, attention weights out
    )
    cost = pl.CostEstimate(flops=flops, transcendentals=transcendentals,
                           bytes_accessed=bytes_accessed)

    out_shapes = (
        jax.ShapeDtypeStruct((B, H), query.dtype),   # context slab
        jax.ShapeDtypeStruct((B, S), query.dtype),   # attention-weights slab
    )

    ctx2d, wts2d = pl.pallas_call(
        attention_kernel,
        out_shape=out_shapes,
        grid_spec=pltpu.PrefetchScalarGridSpec(
            num_scalar_prefetch=0,
            grid=grid,
            in_specs=[
                pl.BlockSpec((block_b, H), lambda b: (b, 0)),        # query
                pl.BlockSpec((block_b, S, H), lambda b: (b, 0, 0)),  # keys
                pl.BlockSpec((H, H), lambda b: (0, 0)),              # W1^T
                pl.BlockSpec((1, H), lambda b: (0, 0)),              # b1
                pl.BlockSpec((H, H), lambda b: (0, 0)),              # W2^T
                pl.BlockSpec((1, H), lambda b: (0, 0)),              # b2
                pl.BlockSpec((1, 1, H), lambda b: (0, 0, 0)),        # V
                pl.BlockSpec((1, 1, 1), lambda b: (0, 0, 0)),        # bV
            ],
            out_specs=[
                pl.BlockSpec((block_b, H), lambda b: (b, 0)),        # context
                pl.BlockSpec((block_b, S), lambda b: (b, 0)),        # weights
            ],
            scratch_shapes=[
                pltpu.VMEM((block_b, 1, H), jnp.float32),            # q1 / ctx bridge
                pltpu.VMEM((block_b, 1, S), jnp.float32),            # weights bridge
            ],
        ),
        compiler_params=pltpu.CompilerParams(
            dimension_semantics=("parallel",),    # batch blocks shard across TCs
            vmem_limit_bytes=vmem_limit,
        ),
        cost_estimate=cost,
    )(q2d, keys, w1t, b1_2d, w2t, b2_2d, v_3d, bv_3d)

    # Restore the PyTorch module's output layout.
    return ctx2d.reshape(B, 1, H), wts2d.reshape(B, 1, S)


def reference(query, keys, w1, b1, w2, b2, v, bv):
    q1 = jnp.einsum("bqh,oh->bqo", query, w1) + b1
    k2 = jnp.einsum("bsh,oh->bso", keys, w2) + b2
    t = jnp.tanh(q1 + k2)                                   # (B, S, H)
    scores = jnp.einsum("bsh,oh->bso", t, v) + bv           # (B, S, 1)
    scores = jnp.transpose(scores, (0, 2, 1))               # (B, 1, S)
    weights = jax.nn.softmax(scores, axis=-1)
    context = jnp.einsum("bqs,bsh->bqh", weights, keys)
    return context, weights


if __name__ == "__main__":
    # Small shapes, but enough batch to exercise batch-blocking (TB=8, grid=2).
    B, S, H = 16, 8, 32
    key = jax.random.PRNGKey(0)
    kq, kk, k1, k2_, k3, k4, k5, k6 = jax.random.split(key, 8)

    query = jax.random.normal(kq, (B, 1, H), dtype=jnp.float32)
    keys = jax.random.normal(kk, (B, S, H), dtype=jnp.float32)

    # deterministic PyTorch-Linear-style init: U(-1/sqrt(H), 1/sqrt(H))
    bound = 1.0 / (H ** 0.5)
    w1 = jax.random.uniform(k1, (H, H), jnp.float32, -bound, bound)
    b1 = jax.random.uniform(k2_, (H,), jnp.float32, -bound, bound)
    w2 = jax.random.uniform(k3, (H, H), jnp.float32, -bound, bound)
    b2 = jax.random.uniform(k4, (H,), jnp.float32, -bound, bound)
    v = jax.random.uniform(k5, (1, H), jnp.float32, -bound, bound)
    bv = jax.random.uniform(k6, (1,), jnp.float32, -bound, bound)

    attn = jax.jit(bahdanau_attention)
    context, weights = attn(query, keys, w1, b1, w2, b2, v, bv)
    jax.block_until_ready((context, weights))

    ctx_ref, wts_ref = reference(query, keys, w1, b1, w2, b2, v, bv)
    # Tolerance loosened (vs 1e-5) because the softmax uses the approximate
    # EUP reciprocal.
    assert jnp.allclose(context, ctx_ref, atol=5e-3, rtol=5e-3)
    assert jnp.allclose(weights, wts_ref, atol=5e-3, rtol=5e-3)

    print("KERNEL_OK")
</pallas_src>

<mosaic_0001>
module attributes {stable_mosaic.version = 11 : i64} {
  func.func @attention_kernel(%arg0: i32, %arg1: memref<8x32xf32, #tpu.memory_space<vmem>>, %arg2: memref<8x8x32xf32, #tpu.memory_space<vmem>>, %arg3: memref<32x32xf32, #tpu.memory_space<vmem>>, %arg4: memref<1x32xf32, #tpu.memory_space<vmem>>, %arg5: memref<32x32xf32, #tpu.memory_space<vmem>>, %arg6: memref<1x32xf32, #tpu.memory_space<vmem>>, %arg7: memref<1x1x32xf32, #tpu.memory_space<vmem>>, %arg8: memref<1x1x1xf32, #tpu.memory_space<vmem>>, %arg9: memref<8x32xf32, #tpu.memory_space<vmem>>, %arg10: memref<8x8xf32, #tpu.memory_space<vmem>>, %arg11: memref<8x1x32xf32, #tpu.memory_space<vmem>>, %arg12: memref<8x1x8xf32, #tpu.memory_space<vmem>>) attributes {dimension_semantics = [#tpu.dimension_semantics<parallel>], iteration_bounds = array<i64: 2>, scalar_prefetch = 0 : i64, scratch_operands = 2 : i64, tpu.core_type = #tpu.core_type<tc>, window_params = [{transform_indices = @transform_0, window_bounds = array<i64: 8, 32>}, {transform_indices = @transform_1, window_bounds = array<i64: 8, 8, 32>}, {pipeline_mode = #tpu.pipeline_mode<synchronous>, transform_indices = @transform_2, window_bounds = array<i64: 32, 32>}, {pipeline_mode = #tpu.pipeline_mode<synchronous>, transform_indices = @transform_3, window_bounds = array<i64: 1, 32>}, {pipeline_mode = #tpu.pipeline_mode<synchronous>, transform_indices = @transform_4, window_bounds = array<i64: 32, 32>}, {pipeline_mode = #tpu.pipeline_mode<synchronous>, transform_indices = @transform_5, window_bounds = array<i64: 1, 32>}, {pipeline_mode = #tpu.pipeline_mode<synchronous>, transform_indices = @transform_6, window_bounds = array<i64: 1, 1, 32>}, {pipeline_mode = #tpu.pipeline_mode<synchronous>, transform_indices = @transform_7, window_bounds = array<i64: 1, 1, 1>}, {transform_indices = @transform_8, window_bounds = array<i64: 8, 32>}, {transform_indices = @transform_9, window_bounds = array<i64: 8, 8>}]} {
    %c0 = arith.constant 0 : index
    %c0_0 = arith.constant 0 : index
    %0 = vector.load %arg1[%c0, %c0_0] : memref<8x32xf32, #tpu.memory_space<vmem>>, vector<8x32xf32>
    %c0_1 = arith.constant 0 : index
    %c0_2 = arith.constant 0 : index
    %1 = vector.load %arg3[%c0_1, %c0_2] : memref<32x32xf32, #tpu.memory_space<vmem>>, vector<32x32xf32>
    %cst = arith.constant dense<0.000000e+00> : vector<8x32xf32>
    %2 = tpu.matmul %0, %1, %cst {dimension_numbers = #tpu.dot_dimension_numbers<[1], [0], [0], [1], [0, 0, 1, 1], [], []>} : vector<8x32xf32>, vector<32x32xf32>, vector<8x32xf32> -> vector<8x32xf32>
    %c0_3 = arith.constant 0 : index
    %c0_4 = arith.constant 0 : index
    %3 = vector.load %arg4[%c0_3, %c0_4] : memref<1x32xf32, #tpu.memory_space<vmem>>, vector<1x32xf32>
    %4 = vector.broadcast %3 : vector<1x32xf32> to vector<8x32xf32>
    %5 = arith.addf %2, %4 : vector<8x32xf32>
    %c0_5 = arith.constant 0 : index
    %c0_6 = arith.constant 0 : index
    %c0_7 = arith.constant 0 : index
    %6 = vector.load %arg2[%c0_5, %c0_6, %c0_7] : memref<8x8x32xf32, #tpu.memory_space<vmem>>, vector<8x8x32xf32>
    %7 = vector.shape_cast %6 : vector<8x8x32xf32> to vector<64x32xf32>
    %c0_8 = arith.constant 0 : index
    %c0_9 = arith.constant 0 : index
    %8 = vector.load %arg5[%c0_8, %c0_9] : memref<32x32xf32, #tpu.memory_space<vmem>>, vector<32x32xf32>
    %cst_10 = arith.constant dense<0.000000e+00> : vector<64x32xf32>
    %9 = tpu.matmul %7, %8, %cst_10 {dimension_numbers = #tpu.dot_dimension_numbers<[1], [0], [0], [1], [0, 0, 1, 1], [], []>} : vector<64x32xf32>, vector<32x32xf32>, vector<64x32xf32> -> vector<64x32xf32>
    %c0_11 = arith.constant 0 : index
    %c0_12 = arith.constant 0 : index
    %10 = vector.load %arg6[%c0_11, %c0_12] : memref<1x32xf32, #tpu.memory_space<vmem>>, vector<1x32xf32>
    %11 = vector.broadcast %10 : vector<1x32xf32> to vector<64x32xf32>
    %12 = arith.addf %9, %11 : vector<64x32xf32>
    %13 = vector.shape_cast %12 : vector<64x32xf32> to vector<8x8x32xf32>
    %c0_13 = arith.constant 0 : index
    %c0_14 = arith.constant 0 : index
    %c0_15 = arith.constant 0 : index
    %14 = vector.load %arg11[%c0_13, %c0_14, %c0_15] : memref<8x1x32xf32, #tpu.memory_space<vmem>>, vector<8x1x32xf32>
    %15 = vector.shape_cast %14 : vector<8x1x32xf32> to vector<8x32xf32>
    %16 = vector.shape_cast %5 : vector<8x32xf32> to vector<8x1x32xf32>
    tpu.vector_store %arg11[%c0_13, %c0_14, %c0_15], %16 {strides = array<i32>} : memref<8x1x32xf32, #tpu.memory_space<vmem>>, vector<8x1x32xf32>,
    %c0_16 = arith.constant 0 : index
    %c0_17 = arith.constant 0 : index
    %c0_18 = arith.constant 0 : index
    %17 = vector.load %arg11[%c0_16, %c0_17, %c0_18] : memref<8x1x32xf32, #tpu.memory_space<vmem>>, vector<8x1x32xf32>
    %18 = vector.broadcast %17 : vector<8x1x32xf32> to vector<8x8x32xf32>
    %19 = arith.addf %18, %13 : vector<8x8x32xf32>
    %20 = math.tanh %19 : vector<8x8x32xf32>
    %c0_19 = arith.constant 0 : index
    %c0_20 = arith.constant 0 : index
    %c0_21 = arith.constant 0 : index
    %21 = vector.load %arg7[%c0_19, %c0_20, %c0_21] : memref<1x1x32xf32, #tpu.memory_space<vmem>>, vector<1x1x32xf32>
    %22 = vector.shape_cast %21 : vector<1x1x32xf32> to vector<1x1x32xf32>
    %23 = vector.broadcast %22 : vector<1x1x32xf32> to vector<8x1x32xf32>
    "tpu.trace_start"() <{level = 10 : i32, message = "bqh,bsh->bqs"}> : () -> ()
    %cst_22 = arith.constant dense<0.000000e+00> : vector<8x1x8xf32>
    %24 = tpu.matmul %23, %20, %cst_22 {dimension_numbers = #tpu.dot_dimension_numbers<[2], [2], [1], [1], [0, 0, 0, 1, 1, 1], [0], [0]>} : vector<8x1x32xf32>, vector<8x8x32xf32>, vector<8x1x8xf32> -> vector<8x1x8xf32>
    "tpu.trace_stop"() : () -> ()
    %c0_23 = arith.constant 0 : index
    %c0_24 = arith.constant 0 : index
    %c0_25 = arith.constant 0 : index
    %25 = vector.load %arg8[%c0_23, %c0_24, %c0_25] : memref<1x1x1xf32, #tpu.memory_space<vmem>>, vector<1x1x1xf32>
    %26 = vector.broadcast %25 : vector<1x1x1xf32> to vector<8x1x8xf32>
    %27 = arith.addf %24, %26 : vector<8x1x8xf32>
    %cst_26 = arith.constant dense<0xFF800000> : vector<8x1xf32>
    %28 = vector.multi_reduction <maximumf>, %27, %cst_26 [2] : vector<8x1x8xf32> to vector<8x1xf32>
    %29 = vector.shape_cast %28 : vector<8x1xf32> to vector<8x1x1xf32>
    %30 = vector.broadcast %29 : vector<8x1x1xf32> to vector<8x1x8xf32>
    %31 = arith.subf %27, %30 : vector<8x1x8xf32>
    %32 = math.exp %31 : vector<8x1x8xf32>
    %cst_27 = arith.constant dense<0.000000e+00> : vector<8x1xf32>
    %33 = vector.multi_reduction <add>, %32, %cst_27 [2] : vector<8x1x8xf32> to vector<8x1xf32>
    %34 = vector.shape_cast %33 : vector<8x1xf32> to vector<8x1x1xf32>
    %35 = tpu.reciprocal %34 {approx = true} : vector<8x1x1xf32> -> vector<8x1x1xf32>
    %36 = vector.broadcast %35 : vector<8x1x1xf32> to vector<8x1x8xf32>
    %37 = arith.mulf %32, %36 : vector<8x1x8xf32>
    "tpu.trace_start"() <{level = 10 : i32, message = "bqs,bsh->bqh"}> : () -> ()
    %cst_28 = arith.constant dense<0.000000e+00> : vector<8x1x32xf32>
    %38 = tpu.matmul %37, %6, %cst_28 {dimension_numbers = #tpu.dot_dimension_numbers<[2], [1], [1], [2], [0, 0, 0, 1, 1, 2], [0], [0]>} : vector<8x1x8xf32>, vector<8x8x32xf32>, vector<8x1x32xf32> -> vector<8x1x32xf32>
    "tpu.trace_stop"() : () -> ()
    %c0_29 = arith.constant 0 : index
    %c0_30 = arith.constant 0 : index
    %c0_31 = arith.constant 0 : index
    %39 = vector.load %arg12[%c0_29, %c0_30, %c0_31] : memref<8x1x8xf32, #tpu.memory_space<vmem>>, vector<8x1x8xf32>
    tpu.vector_store %arg12[%c0_29, %c0_30, %c0_31], %37 {strides = array<i32>} : memref<8x1x8xf32, #tpu.memory_space<vmem>>, vector<8x1x8xf32>,
    %c0_32 = arith.constant 0 : index
    %c0_33 = arith.constant 0 : index
    %c0_34 = arith.constant 0 : index
    %40 = vector.load %arg12[%c0_32, %c0_33, %c0_34] : memref<8x1x8xf32, #tpu.memory_space<vmem>>, vector<8x1x8xf32>
    %41 = vector.shape_cast %40 : vector<8x1x8xf32> to vector<8x8xf32>
    %c0_35 = arith.constant 0 : index
    %c0_36 = arith.constant 0 : index
    %42 = vector.load %arg10[%c0_35, %c0_36] : memref<8x8xf32, #tpu.memory_space<vmem>>, vector<8x8xf32>
    tpu.vector_store %arg10[%c0_35, %c0_36], %41 {strides = array<i32>} : memref<8x8xf32, #tpu.memory_space<vmem>>, vector<8x8xf32>,
    %c0_37 = arith.constant 0 : index
    %c0_38 = arith.constant 0 : index
    %c0_39 = arith.constant 0 : index
    %43 = vector.load %arg11[%c0_37, %c0_38, %c0_39] : memref<8x1x32xf32, #tpu.memory_space<vmem>>, vector<8x1x32xf32>
    tpu.vector_store %arg11[%c0_37, %c0_38, %c0_39], %38 {strides = array<i32>} : memref<8x1x32xf32, #tpu.memory_space<vmem>>, vector<8x1x32xf32>,
    %c0_40 = arith.constant 0 : index
    %c0_41 = arith.constant 0 : index
    %c0_42 = arith.constant 0 : index
    %44 = vector.load %arg11[%c0_40, %c0_41, %c0_42] : memref<8x1x32xf32, #tpu.memory_space<vmem>>, vector<8x1x32xf32>
    %45 = vector.shape_cast %44 : vector<8x1x32xf32> to vector<8x32xf32>
    %c0_43 = arith.constant 0 : index
    %c0_44 = arith.constant 0 : index
    %46 = vector.load %arg9[%c0_43, %c0_44] : memref<8x32xf32, #tpu.memory_space<vmem>>, vector<8x32xf32>
    tpu.vector_store %arg9[%c0_43, %c0_44], %45 {strides = array<i32>} : memref<8x32xf32, #tpu.memory_space<vmem>>, vector<8x32xf32>,
    return
  }
  func.func @transform_0(%arg0: i32) -> (i32, i32) {
    %c0_i32 = arith.constant 0 : i32
    %c0_i32_0 = arith.constant 0 : i32
    return %arg0, %c0_i32 : i32, i32
  }
  func.func @transform_1(%arg0: i32) -> (i32, i32, i32) {
    %c0_i32 = arith.constant 0 : i32
    %c0_i32_0 = arith.constant 0 : i32
    %c0_i32_1 = arith.constant 0 : i32
    return %arg0, %c0_i32, %c0_i32_0 : i32, i32, i32
  }
  func.func @transform_2(%arg0: i32) -> (i32, i32) {
    %c0_i32 = arith.constant 0 : i32
    %c0_i32_0 = arith.constant 0 : i32
    %c0_i32_1 = arith.constant 0 : i32
    return %c0_i32, %c0_i32_0 : i32, i32
  }
  func.func @transform_3(%arg0: i32) -> (i32, i32) {
    %c0_i32 = arith.constant 0 : i32
    %c0_i32_0 = arith.constant 0 : i32
    %c0_i32_1 = arith.constant 0 : i32
    return %c0_i32, %c0_i32_0 : i32, i32
  }
  func.func @transform_4(%arg0: i32) -> (i32, i32) {
    %c0_i32 = arith.constant 0 : i32
    %c0_i32_0 = arith.constant 0 : i32
    %c0_i32_1 = arith.constant 0 : i32
    return %c0_i32, %c0_i32_0 : i32, i32
  }
  func.func @transform_5(%arg0: i32) -> (i32, i32) {
    %c0_i32 = arith.constant 0 : i32
    %c0_i32_0 = arith.constant 0 : i32
    %c0_i32_1 = arith.constant 0 : i32
    return %c0_i32, %c0_i32_0 : i32, i32
  }
  func.func @transform_6(%arg0: i32) -> (i32, i32, i32) {
    %c0_i32 = arith.constant 0 : i32
    %c0_i32_0 = arith.constant 0 : i32
    %c0_i32_1 = arith.constant 0 : i32
    %c0_i32_2 = arith.constant 0 : i32
    return %c0_i32, %c0_i32_0, %c0_i32_1 : i32, i32, i32
  }
  func.func @transform_7(%arg0: i32) -> (i32, i32, i32) {
    %c0_i32 = arith.constant 0 : i32
    %c0_i32_0 = arith.constant 0 : i32
    %c0_i32_1 = arith.constant 0 : i32
    %c0_i32_2 = arith.constant 0 : i32
    return %c0_i32, %c0_i32_0, %c0_i32_1 : i32, i32, i32
  }
  func.func @transform_8(%arg0: i32) -> (i32, i32) {
    %c0_i32 = arith.constant 0 : i32
    %c0_i32_0 = arith.constant 0 : i32
    return %arg0, %c0_i32 : i32, i32
  }
  func.func @transform_9(%arg0: i32) -> (i32, i32) {
    %c0_i32 = arith.constant 0 : i32
    %c0_i32_0 = arith.constant 0 : i32
    return %arg0, %c0_i32 : i32, i32
  }
}

</mosaic_0001>

<bundles_post_ra>
// kernel: bahdanau_attention.1
= control target key start
LH: loop header
LB: loop body
LE: loop exit
PB: predicated region body
PF: predicated region fallthrough
CT: control target
= control target key end

     0   :  { %s3031_s0 = inlined_call_operand.vmem [shape: f32[16,32], index: 0, kind: input, shape index: {}]   ;;  %s3032_s1 = inlined_call_operand.vmem [shape: f32[16,8,32], index: 1, kind: input, shape index: {}]   ;;  %s3033_s2 = inlined_call_operand.vmem [shape: f32[32,32], index: 2, kind: input, shape index: {}]   ;;  %s3034_s3 = inlined_call_operand.vmem [shape: f32[1,32], index: 3, kind: input, shape index: {}]   ;;  %s3035_s4 = inlined_call_operand.vmem [shape: f32[32,32], index: 4, kind: input, shape index: {}]   ;;  %s3036_s5 = inlined_call_operand.vmem [shape: f32[1,32], index: 5, kind: input, shape index: {}]   ;;  %s3037_s6 = inlined_call_operand.vmem [shape: f32[1,1,32], index: 6, kind: input, shape index: {}]   ;;  %s3038_s7 = inlined_call_operand.<no memory space> [shape: f32[1,1,1], index: 7, kind: input, shape index: {}]   ;;  %s3039_s8 = inlined_call_operand.hbm [shape: f32[16,32], index: 8, kind: output, shape index: {0}]   ;;  %s3040_s9 = inlined_call_operand.vmem [shape: f32[16,8], index: 9, kind: output, shape index: {1}]  }
   0x1   :  { %v15_v0 = vstv %s3038_s7 }
   0x2   :  { %16 = vst [vmem:[#allocation4] sm:$0x1] %v15_v0 }
   0x3   :  { %17 = vsyncpa [#allocation6], 0 }
   0x4   :  { %19 = vsyncpa [#allocation6 + $0x1], 0  ;;  %s2702_s11 = smov 0   ;;  %s2704_s12 = smov 0  }
   0x5   :  { %s2706_s13 = smov 0   ;;  %s2708_s14 = smov 0  }
   0x6 LB: > { %s2723_s7 = sadd.s32 4294967295, %s2642_s14   ;;  %s2274_s15 = sadd.s32 4294967294, %s2642_s14   ;;  %s2642_s14 = sphi %s2708_s14, %s3047_s14   ;;  %s2638_s13 = sphi %s2706_s13, %s3046_s13   ;;  %s2634_s12 = sphi %s2704_s12, %s3045_s12   ;;  %s2630_s11 = sphi %s2702_s11, %s3044_s11  }
   0x7   : > { %s2727_s16 = sadd.s32 1, %s2642_s14   ;;  %s210_s17 = sadd.s32 1, %s2638_s13 }
   0x8   : > { %s207_s18 = ssub.s32 %s2642_s14, %s2727_s16  ;;  %p220_p0 = scmp.ne.s32.totalorder %s2638_s13, %s2634_s12 }
   0x9   : > { %p208_p1 = scmp.eq.s32.totalorder %s207_s18, 0  ;;  %p221_p2 = scmp.eq.s32.totalorder %s2723_s7, 1 }
   0xa   : > { %p226_p3 = scmp.ne.s32.totalorder %s2634_s12, %s2630_s11  ;;  %p227_p4 = scmp.eq.s32.totalorder %s2274_s15, 1 }
   0xb   : > { %s2738_s19 = scalar_select %p208_p1, %s2638_s13, %s210_s17  }
   0xc   : > { %p2740_p5 = por %p221_p2, %p220_p0  ;;  %p2744_p6 = por %p227_p4, %p226_p3 }
   0xd   : > { %p2277_p7 = scmp.ge.s32.totalorder %s2642_s14, 1  ;;  %p305_p8 = scmp.lt.s32.totalorder %s2642_s14, 3 }
   0xf   : > { %p306_p9 = pnand %p2277_p7, %p305_p8 }
  0x10   : > { %p349_p10 = scmp.lt.s32.totalorder (!%p306_p9), %s2723_s7, 1  ;;  %s2280_s30 = sshll.u32 (!%p306_p9), %s2723_s7, 3 }
  0x11   : > { %309 = sbr.rel (%p306_p9) target bundleno = 1016 (0x3f8), region = 52  ;;  %p2775_p11 = scmp.lt.s32.totalorder (!%p306_p9), %s2280_s30, 15 }
  0x12   : > { %s2327_s25 = sshll.u32 (!%p306_p9), %s2723_s7, 7 }
  0x13   : > { %s2174_s28 = scalar_lea.hbm (!%p306_p9), %s3039_s8, %s2327_s25 }
  0x16   : > { %v367_v1 = vld [vmem:[%s3033_s2 + $0x18] sm:$0xff]  ;;  %v2644_v3 = vmov 0.0   ;;  %v366_v4 = vld [vmem:[%s3033_s2 + $0x10] sm:$0xff]  ;;  %v458_v6 = vld [vmem:[%s3035_s4 + $0x8] sm:$0xff]  ;;  %s2769_s17 = scalar_select %p349_p10, %s2723_s7, 1  ;;  %vm2645_vm0 = vmmov 0   ;;  %v602_v23 = vlaneseq }
  0x17   : > { %v460_v2 = vld [vmem:[%s3035_s4 + $0x18] sm:$0xff]  ;;  %2379 = vmatprep.subr.mxu0 %v2644_v3  ;;  %v459_v5 = vld [vmem:[%s3035_s4 + $0x10] sm:$0xff]  ;;  %v365_v7 = vld [vmem:[%s3033_s2 + $0x8] sm:$0xff]  ;;  %2387 = vmatprep.mubr.msk.f32.mxu0 %vm2645_vm0, %v2644_v3  ;;  %vm375_vm1 = vcmask 261120   ;;  %s3049_s30 = smov (!%p2775_p11, %s2280_s30), 15  ;;  %v2646_v20 = vmov 0  }
  0x18   : > { %2390 = vmatprep.subr.mxu1 %v460_v2  ;;  %2380 = vmatpush3.msra.mxu0 %v367_v1  ;;  %s2279_s24 = sshll.u32 %s2769_s17, 3  ;;  %v364_v8 = vld [vmem:[%s3033_s2] sm:$0xff]  ;;  %s2281_s18 = sshll.u32 %s3049_s30, 3  ;;  %v737_v19 = vld [vmem:[#allocation4] sm:$0x1]  ;;  %v2839_v25 = vshrl.u32 %v602_v23, 7 }
  0x19   : > { %2391 = vmatpush3.msra.mxu1 %v460_v2  ;;  %2381 = vmatprep.subr.mxu0 %v2644_v3  ;;  %s352_s29 = scalar_lea.vmem %s3031_s0, %s2279_s24  ;;  %v457_v9 = vld [vmem:[%s3035_s4] sm:$0xff]  ;;  %s357_s26 = scalar_lea.vmem %s3032_s1, %s2281_s18  ;;  %v2647_v21 = vmov 1966171168   ;;  %vm655_vm2 = vcmask 253952   ;;  %vm1334_vm3 = vcmask 57344   ;;  %vm1423_vm4 = vcmask 64512  }
  0x1a   : > { %2392 = vmatprep.subr.mxu1 %v459_v5  ;;  %2382 = vmatpush3.msra.mxu0 %v366_v4  ;;  %v363_v10 = vld [vmem:[%s352_s29] sm:$0xff]  ;;  %v2803_v12 = vld [vmem:[%s357_s26 + $0x8] sm:$0xff]  ;;  %v2805_v13 = vld [vmem:[%s357_s26 + $0x10] sm:$0xff]  ;;  %v600_v22 = vunpack.c.l.s4 %v2647_v21  ;;  %s362_s22 = scalar_lea.vmem %s3040_s9, %s2279_s24  ;;  %s340_s17 = sand.u32 1, %s2634_s12  }
  0x1b   : > { %2393 = vmatpush3.msra.mxu1 %v459_v5  ;;  %2383 = vmatprep.subr.mxu0 %v2644_v3  ;;  %v2801_v11 = vld [vmem:[%s357_s26] sm:$0xff]  ;;  %v2817_v14 = vld [vmem:[%s357_s26 + $0x18] sm:$0xff]  ;;  %v2825_v16 = vld [vmem:[%s357_s26 + $0x28] sm:$0xff]  ;;  %s2278_s24 = sshll.u32 %s340_s17, 3  ;;  %s2159_s29 = scalar_lea.sflag [#allocation6], %s340_s17 }
  0x1c   : > { %2394 = vmatprep.subr.mxu1 %v458_v6  ;;  %2384 = vmatpush3.msra.mxu0 %v365_v7  ;;  %v2819_v15 = vld [vmem:[%s357_s26 + $0x20] sm:$0xff]  ;;  %v2827_v17 = vld [vmem:[%s357_s26 + $0x30] sm:$0xff]  ;;  %v2833_v18 = vld [vmem:[%s357_s26 + $0x38] sm:$0xff]  ;;  %v601_v24 = vunpack.c.0.s8 %v600_v22  ;;  %s342_s26 = scalar_lea.vmem [#allocation5], %s2278_s24  ;;  %s2648_s7 = smov [#allocation5]  }
  0x1d   : > { %2385 = vmatprep.subr.mxu0 %v2644_v3  ;;  %2395 = vmatpush3.msra.mxu1 %v458_v6  ;;  %v2283_v26 = vld [vmem:[%s3034_s3] ss:$0 sm:$0xff]  ;;  %s2176_s30 = sshll.u32 %s342_s26, 4  ;;  %s2586_s15 = sshll.u32 %s2648_s7, 4  ;;  %s2177_s30 = int_to_ptr.vmem [resolvable:$true] %s2176_s30  ;;  %s2587_s15 = int_to_ptr.vmem [resolvable:$false] %s2586_s15 }
  0x1e   : > { %2386 = vmatpush3.msra.mxu0 %v364_v8  ;;  %2396 = vmatprep.subr.mxu1 %v457_v9  ;;  %v2845_v27 = vsub.s32 %v601_v24, %v2839_v25  ;;  %v2285_v47 = vld [vmem:[%s3036_s5] ss:$0 sm:$0xff]  ;;  %s2582_s10 = scalar_lea.vmem %s2177_s30, 128  ;;  %s2588_s18 = scalar_lea.vmem %s2587_s15, 256 }
  0x1f   : > { %2388 = vmatmul.mubr.msk.f32.vlgmr.msra.gmra.mxu0 %vm375_vm1, %v363_v10  ;;  %2397 = vmatpush3.msra.mxu1 %v457_v9  ;;  %v736_v22 = vld [vmem:[%s3037_s6] sm:$0x1]  ;;  %p2583_p12 = scmp.ne.s32.totalorder %s2177_s30, %s2582_s10  ;;  %p2589_p1 = scmp.lt.s32.totalorder %s2177_s30, %s2587_s15 }
  0x20   : > { %2410 = vmatprep.subr.mxu0 %v2644_v3  ;;  %2430 = vmatprep.subr.mxu1 %v2644_v3  ;;  %p2590_p2 = scmp.lt.s32.totalorder %s2588_s18, %s2582_s10 }
  0x21   : > { %2398 = vmatprep.mubr.msk.f32.mxu1 %vm375_vm1, %v2801_v11  ;;  %2412 = vmatprep.mubr.msk.f32.mxu0 %vm2645_vm0, %v2644_v3  ;;  %p2584_p13 = pnand %p2583_p12, %p2740_p5 }
  0x22   : > { %2399 = vmatmul.mubr.msk.f32.vlgmr.msra.gmra.mxu1 %vm375_vm1, %v2803_v12  ;;  %2533 = vset.pattern.permute.xlu0 %v2646_v20  ;;  %p2591_p3 = por %p2590_p2, %p2589_p1 }
  0x23   : > { %2401 = vmatprep.mubr.msk.f32.mxu1 %vm375_vm1, %v2805_v13  ;;  %740 = vperm.xlu0 %2533, %v737_v19   ;;  %p2585_p0 = pneg %p2584_p13 }
  0x25   : > { %p2592_p4 = pnand %p2591_p3, %p2585_p0 }
  0x26   : > { %2402 = vmatmul.mubr.msk.f32.gmra.mxu1 %vm375_vm1, %v2817_v14 }
  0x27   : > { %2404 = vmatprep.mubr.msk.f32.mxu1 %vm375_vm1, %v2819_v15 }
  0x2a   : > { %2405 = vmatmul.mubr.msk.f32.gmra.mxu1 %vm375_vm1, %v2825_v16 }
  0x2b   : > { %2407 = vmatprep.mubr.msk.f32.mxu1 %vm375_vm1, %v2827_v17 }
  0x2e   : > { %2408 = vmatmul.mubr.msk.f32.gmra.mxu1 %vm375_vm1, %v2833_v18 }
  0x2f   : > { %2432 = vmatprep.mubr.msk.f32.mxu1 %vm2645_vm0, %v2644_v3 }
  0xdf   : > { %v445_v28 = vpop.f32.mrf.mxu0 }
  0xe0   : > { %v446_v29 = vadd.f32 %v2283_v26, %v445_v28 }
  0xe1   : > { %v2389_v30 = vpop.f32.mrf.mxu0 }
  0xe2   : > { %v598_v31 = vcombine.high %v446_v29, %v446_v29  ;;  %v605_v32 = vrot.slane %v446_v29, %v2845_v27  ;;  %v2400_v33 = vpop.f32.mrf.mxu1 }
  0xe3   : > { %v564_v53 = vadd.f32 %v2400_v33, %v2285_v47  ;;  %v741_v33 = vpop.permute.xlu0 %740 }
  0xe4   : > { %v612_v34 = vrot.slane %v598_v31, %v2845_v27  ;;  %v613_v35 = vcombine.high %v605_v32, %v605_v32  ;;  %v621_v36 = vrot.slane %v605_v32, %v2845_v27  ;;  %v558_v37 = vpop.f32.mrf.mxu1 }
  0xe5   : > { %v559_v50 = vadd.f32 %v2285_v47, %v558_v37 }
  0xe6   : > { %v614_v38 = vcombine.high %v612_v34, %v612_v34  ;;  %v628_v39 = vrot.slane %v612_v34, %v2845_v27  ;;  %v635_v40 = vrot.slane %v613_v35, %v2845_v27  ;;  %v643_v41 = vcombine.high %v621_v36, %v621_v36  ;;  %656 = vst.msk [vmem:[#allocation2] sm:$0x1] %vm655_vm2, %v621_v36  ;;  %v2403_v42 = vpop.f32.mrf.mxu1 }
  0xe7   : > { %v574_v5 = vadd.f32 %v2403_v42, %v2285_v47 }
  0xe8   : > { %v642_v43 = vrot.slane %v614_v38, %v2845_v27  ;;  %v644_v44 = vcombine.high %v628_v39, %v628_v39  ;;  %v645_v45 = vcombine.high %v635_v40, %v635_v40  ;;  %657 = vst.msk [vmem:[#allocation2 + $0x1] sm:$0x1] %vm655_vm2, %v635_v40  ;;  %658 = vst.msk [vmem:[#allocation2 + $0x2] sm:$0x1] %vm655_vm2, %v643_v41  ;;  %v568_v46 = vpop.f32.mrf.mxu1 }
  0xe9   : > { %660 = vst.msk [vmem:[#allocation2 + $0x4] sm:$0x1] %vm655_vm2, %v628_v39  ;;  %v569_v62 = vadd.f32 %v2285_v47, %v568_v46 }
  0xea   : > { %v646_v48 = vcombine.high %v642_v43, %v642_v43  ;;  %659 = vst.msk [vmem:[#allocation2 + $0x3] sm:$0x1] %vm655_vm2, %v645_v45  ;;  %661 = vst.msk [vmem:[#allocation2 + $0x5] sm:$0x1] %vm655_vm2, %v642_v43  ;;  %v2406_v49 = vpop.f32.mrf.mxu1 }
  0xeb   : > { %662 = vst.msk [vmem:[#allocation2 + $0x6] sm:$0x1] %vm655_vm2, %v644_v44  ;;  %v584_v9 = vadd.f32 %v2406_v49, %v2285_v47 }
  0xec   : > { %663 = vst.msk [vmem:[#allocation2 + $0x7] sm:$0x1] %vm655_vm2, %v646_v48  ;;  %v578_v51 = vpop.f32.mrf.mxu1 }
  0xed   : > { %v2294_v52 = vld [vmem:[#allocation2] ss:$0 sm:$0xff]  ;;  %v579_v59 = vadd.f32 %v2285_v47, %v578_v51 }
  0xee   : > { %v720_v54 = vadd.f32 %v2294_v52, %v559_v50  ;;  %v2409_v55 = vpop.f32.mrf.mxu1 }
  0xef   : > { %v2295_v56 = vld [vmem:[#allocation2 + $0x1] ss:$0 sm:$0xff]  ;;  %v2296_v61 = vld [vmem:[#allocation2 + $0x2] ss:$0 sm:$0xff]  ;;  %v594_v19 = vadd.f32 %v2409_v55, %v2285_v47 }
  0xf0   : > { %v2298_v57 = vld [vmem:[#allocation2 + $0x4] ss:$0 sm:$0xff]  ;;  %v721_v58 = vadd.f32 %v2295_v56, %v564_v53  ;;  %2534 = vtanh.f32 %v720_v54  ;;  %v588_v60 = vpop.f32.mrf.mxu1  ;;  %v722_v2 = vadd.f32 %v2296_v61, %v569_v62 }
  0xf1   : > { %v724_v63 = vadd.f32 %v2298_v57, %v579_v59  ;;  %v589_v0 = vadd.f32 %v2285_v47, %v588_v60  ;;  %v2297_v4 = vld [vmem:[#allocation2 + $0x3] ss:$0 sm:$0xff]  ;;  %v2299_v8 = vld [vmem:[#allocation2 + $0x5] ss:$0 sm:$0xff] }
  0xf2   : > { %v2300_v1 = vld [vmem:[#allocation2 + $0x6] ss:$0 sm:$0xff]  ;;  %2536 = vtanh.f32 %v721_v58  ;;  %v723_v7 = vadd.f32 %v2297_v4, %v574_v5  ;;  %v725_v10 = vadd.f32 %v2299_v8, %v584_v9 }
  0xf3   : > { %2538 = vtanh.f32 %v724_v63  ;;  %v726_v6 = vadd.f32 %v2300_v1, %v589_v0  ;;  %v2301_v21 = vld [vmem:[#allocation2 + $0x7] ss:$0 sm:$0xff] }
  0xf4   : > { %2540 = vtanh.f32 %v722_v2  ;;  %v727_v23 = vadd.f32 %v2301_v21, %v594_v19 }
  0xf5   : > { %2542 = vtanh.f32 %v726_v6 }
  0xf6   : > { %2544 = vtanh.f32 %v723_v7 }
  0xf7   : > { %2546 = vtanh.f32 %v725_v10 }
  0xf8   : > { %2548 = vtanh.f32 %v727_v23 }
  0xfd   : > { %v2535_v20 = vpop.eup %2534 }
  0xfe   : > { %2411 = vmatpush3.xpose.msk.msra.mxu0 %vm375_vm1, %v2535_v20 }
  0xff   : > { %2415 = vmatprep.subr.mxu0 %v2644_v3  ;;  %v2537_v24 = vpop.eup %2536 }
 0x100   : > { %v2539_v26 = vpop.eup %2538 }
 0x101   : > { %2413 = vmatmul.mubr.msk.f32.vlgmr.msra.gmra.mxu0 %vm375_vm1, %v736_v22  ;;  %2431 = vmatpush3.xpose.msk.msra.mxu1 %vm375_vm1, %v2539_v26  ;;  %v2541_v28 = vpop.eup %2540 }
 0x102   : > { %2416 = vmatpush3.xpose.msk.msra.mxu0 %vm375_vm1, %v2537_v24  ;;  %2417 = vmatprep.mubr.msk.f32.mxu0 %vm2645_vm0, %v2644_v3  ;;  %v2543_v29 = vpop.eup %2542 }
 0x103   : > { %2420 = vmatprep.subr.mxu0 %v2644_v3  ;;  %2440 = vmatprep.subr.mxu1 %v2644_v3  ;;  %v2545_v30 = vpop.eup %2544 }
 0x104   : > { %2433 = vmatmul.mubr.msk.f32.vlgmr.msra.gmra.mxu1 %vm375_vm1, %v736_v22  ;;  %v2547_v31 = vpop.eup %2546 }
 0x105   : > { %2418 = vmatmul.mubr.msk.f32.vlgmr.msra.gmra.mxu0 %vm375_vm1, %v736_v22  ;;  %2441 = vmatpush3.xpose.msk.msra.mxu1 %vm375_vm1, %v2543_v29  ;;  %v2549_v32 = vpop.eup %2548 }
 0x106   : > { %2421 = vmatpush3.xpose.msk.msra.mxu0 %vm375_vm1, %v2541_v28  ;;  %2422 = vmatprep.mubr.msk.f32.mxu0 %vm2645_vm0, %v2644_v3 }
 0x107   : > { %2425 = vmatprep.subr.mxu0 %v2644_v3  ;;  %2442 = vmatprep.mubr.msk.f32.mxu1 %vm2645_vm0, %v2644_v3 }
 0x108   : > { %2450 = vmatprep.subr.mxu1 %v2644_v3  ;;  %2443 = vmatmul.mubr.msk.f32.vlgmr.msra.gmra.mxu1 %vm375_vm1, %v736_v22 }
 0x109   : > { %2423 = vmatmul.mubr.msk.f32.vlgmr.msra.gmra.mxu0 %vm375_vm1, %v736_v22  ;;  %2451 = vmatpush3.msra.mxu1 %v2801_v11  ;;  %v745_v11 = vsub.s32 0, %v2839_v25 }
 0x10a   : > { %2426 = vmatpush3.xpose.msk.msra.mxu0 %vm375_vm1, %v2545_v30  ;;  %2427 = vmatprep.mubr.msk.f32.mxu0 %vm2645_vm0, %v2644_v3 }
 0x10b   : > { %2435 = vmatprep.subr.mxu0 %v2644_v3  ;;  %2452 = vmatprep.mubr.msk.f32.mxu1 %vm2645_vm0, %v2644_v3  ;;  %v746_v34 = vrot.slane %v741_v33, %v745_v11 }
 0x10c   : > { %2460 = vmatprep.subr.mxu1 %v2644_v3 }
 0x10d   : > { %2428 = vmatmul.mubr.msk.f32.vlgmr.msra.gmra.mxu0 %vm375_vm1, %v736_v22 }
 0x10e   : > { %2436 = vmatpush3.xpose.msk.msra.mxu0 %vm375_vm1, %v2547_v31  ;;  %2437 = vmatprep.mubr.msk.f32.mxu0 %vm2645_vm0, %v2644_v3 }
 0x10f   : > { %2445 = vmatprep.subr.mxu0 %v2644_v3 }
 0x111   : > { %2438 = vmatmul.mubr.msk.f32.vlgmr.msra.gmra.mxu0 %vm375_vm1, %v736_v22 }
 0x112   : > { %2446 = vmatpush3.xpose.msk.msra.mxu0 %vm375_vm1, %v2549_v32  ;;  %2447 = vmatprep.mubr.msk.f32.mxu0 %vm2645_vm0, %v2644_v3 }
 0x113   : > { %2455 = vmatprep.subr.mxu0 %v2644_v3 }
 0x115   : > { %2448 = vmatmul.mubr.msk.f32.vlgmr.msra.gmra.mxu0 %vm375_vm1, %v736_v22 }
 0x116   : > { %2456 = vmatpush3.msra.mxu0 %v2803_v12  ;;  %2457 = vmatprep.mubr.msk.f32.mxu0 %vm2645_vm0, %v2644_v3 }
 0x117   : > { %2465 = vmatprep.subr.mxu0 %v2644_v3 }
 0x1c1   : > { %v819_v35 = vpop.f32.mrf.mxu0 }
 0x1c2   : > { %v820_v36 = vadd.f32 %v819_v35, %v746_v34 }
 0x1c3   : > { %v2414_v37 = vpop.f32.mrf.mxu0 }
 0x1c4   : > { %v1335_v38 = vsel %vm1334_vm3, %v820_v36, -inf  ;;  %v1111_v40 = vpop.f32.mrf.mxu1 }
 0x1c5   : > { %1336 = vmax.xlane.f32.xlu0 %v1335_v38  ;;  %v892_v39 = vpop.f32.mrf.mxu0  ;;  %v1112_v12 = vadd.f32 %v1111_v40, %v746_v34 }
 0x1c6   : > { %v2434_v43 = vpop.f32.mrf.mxu1  ;;  %v893_v44 = vadd.f32 %v892_v39, %v746_v34 }
 0x1c7   : > { %v2419_v41 = vpop.f32.mrf.mxu0  ;;  %v1347_v45 = vsel %vm1334_vm3, %v1112_v12, -inf }
 0x1c8   : > { %1348 = vmax.xlane.f32.xlu1 %v1347_v45  ;;  %v1257_v25 = vpop.f32.mrf.mxu1  ;;  %v1338_v50 = vsel %vm1334_vm3, %v893_v44, -inf }
 0x1c9   : > { %v965_v42 = vpop.f32.mrf.mxu0  ;;  %v1258_v49 = vadd.f32 %v1257_v25, %v746_v34 }
 0x1ca   : > { %v2444_v48 = vpop.f32.mrf.mxu1  ;;  %v966_v53 = vadd.f32 %v965_v42, %v746_v34 }
 0x1cb   : > { %v2424_v46 = vpop.f32.mrf.mxu0  ;;  %v1353_v54 = vsel %vm1334_vm3, %v1258_v49, -inf }
 0x1cc   : > { %1339 = vmax.xlane.f32.xlu1 %v1338_v50  ;;  %v1341_v58 = vsel %vm1334_vm3, %v966_v53, -inf }
 0x1cd   : > { %v1038_v47 = vpop.f32.mrf.mxu0 }
 0x1ce   : > { %v1039_v57 = vadd.f32 %v1038_v47, %v746_v34 }
 0x1cf   : > { %v2429_v51 = vpop.f32.mrf.mxu0 }
 0x1d0   : > { %1354 = vmax.xlane.f32.xlu1 %v1353_v54  ;;  %v1344_v61 = vsel %vm1334_vm3, %v1039_v57, -inf }
 0x1d1   : > { %v1184_v52 = vpop.f32.mrf.mxu0 }
 0x1d2   : > { %v1185_v60 = vadd.f32 %v1184_v52, %v746_v34 }
 0x1d3   : > { %v2439_v55 = vpop.f32.mrf.mxu0 }
 0x1d4   : > { %1342 = vmax.xlane.f32.xlu1 %v1341_v58  ;;  %v1350_v63 = vsel %vm1334_vm3, %v1185_v60, -inf }
 0x1d5   : > { %v1330_v56 = vpop.f32.mrf.mxu0 }
 0x1d6   : > { %v1331_v62 = vadd.f32 %v1330_v56, %v746_v34 }
 0x1d7   : > { %v2449_v59 = vpop.f32.mrf.mxu0 }
 0x1d8   : > { %1345 = vmax.xlane.f32.xlu1 %v1344_v61  ;;  %v1356_v0 = vsel %vm1334_vm3, %v1331_v62, -inf }
 0x1dc   : > { %1351 = vmax.xlane.f32.xlu1 %v1350_v63 }
 0x1e0   : > { %1357 = vmax.xlane.f32.xlu1 %v1356_v0 }
 0x24e   : > { %v1337_v1 = vpop.xlane.xlu0 %1336 }
 0x24f   : > { %v1359_v2 = vsub.f32 %v820_v36, %v1337_v1 }
 0x251   : > { %v1367_v4 = vmul.f32 1.442695, %v1359_v2  ;;  %v1349_v5 = vpop.xlane.xlu1 %1348 }
 0x252   : > { %v1363_v10 = vsub.f32 %v1112_v12, %v1349_v5 }
 0x253   : > { %2550 = vpow2.f32 %v1367_v4 }
 0x254   : > { %v1375_v23 = vmul.f32 1.442695, %v1363_v10 }
 0x255   : > { %v1340_v6 = vpop.xlane.xlu1 %1339 }
 0x256   : > { %v1360_v7 = vsub.f32 %v893_v44, %v1340_v6 }
 0x258   : > { %v1369_v8 = vmul.f32 1.442695, %v1360_v7 }
 0x259   : > { %v1355_v9 = vpop.xlane.xlu1 %1354 }
 0x25a   : > { %2552 = vpow2.f32 %v1369_v8  ;;  %v1365_v24 = vsub.f32 %v1258_v49, %v1355_v9 }
 0x25c   : > { %v1379_v30 = vmul.f32 1.442695, %v1365_v24 }
 0x25d   : > { %v1343_v20 = vpop.xlane.xlu1 %1342 }
 0x25e   : > { %v1361_v21 = vsub.f32 %v966_v53, %v1343_v20 }
 0x260   : > { %v2551_v19 = vpop.eup %2550  ;;  %v1371_v26 = vmul.f32 1.442695, %v1361_v21 }
 0x261   : > { %v1383_v22 = vsel %vm1334_vm3, %v2551_v19, 0.0  ;;  %v1346_v28 = vpop.xlane.xlu1 %1345 }
 0x262   : > { %1384 = vadd.xlane.f32.xlu1 %v1383_v22  ;;  %2554 = vpow2.f32 %v1371_v26  ;;  %v1362_v29 = vsub.f32 %v1039_v57, %v1346_v28 }
 0x263   : > { %2556 = vpow2.f32 %v1375_v23 }
 0x264   : > { %v1373_v31 = vmul.f32 1.442695, %v1362_v29 }
 0x265   : > { %v1352_v32 = vpop.xlane.xlu1 %1351 }
 0x266   : > { %2558 = vpow2.f32 %v1373_v31  ;;  %v1364_v11 = vsub.f32 %v1185_v60, %v1352_v32 }
 0x267   : > { %v2553_v33 = vpop.eup %2552  ;;  %2560 = vpow2.f32 %v1379_v30 }
 0x268   : > { %v1377_v34 = vmul.f32 1.442695, %v1364_v11  ;;  %v1386_v35 = vsel %vm1334_vm3, %v2553_v33, 0.0 }
 0x269   : > { %1387 = vadd.xlane.f32.xlu1 %v1386_v35  ;;  %v1358_v36 = vpop.xlane.xlu1 %1357 }
 0x26a   : > { %2562 = vpow2.f32 %v1377_v34  ;;  %v1366_v37 = vsub.f32 %v1331_v62, %v1358_v36 }
 0x26c   : > { %v1381_v38 = vmul.f32 1.442695, %v1366_v37 }
 0x26e   : > { %2564 = vpow2.f32 %v1381_v38 }
 0x26f   : > { %v2555_v39 = vpop.eup %2554 }
 0x270   : > { %v1389_v40 = vsel %vm1334_vm3, %v2555_v39, 0.0  ;;  %v2557_v41 = vpop.eup %2556 }
 0x271   : > { %1390 = vadd.xlane.f32.xlu0 %v1389_v40  ;;  %v1395_v42 = vsel %vm1334_vm3, %v2557_v41, 0.0 }
 0x273   : > { %v2559_v12 = vpop.eup %2558 }
 0x274   : > { %v1392_v43 = vsel %vm1334_vm3, %v2559_v12, 0.0  ;;  %v2561_v44 = vpop.eup %2560 }
 0x275   : > { %1396 = vadd.xlane.f32.xlu0 %v1395_v42  ;;  %1393 = vadd.xlane.f32.xlu1 %v1392_v43  ;;  %v1401_v25 = vsel %vm1334_vm3, %v2561_v44, 0.0 }
 0x277   : > { %v2563_v45 = vpop.eup %2562 }
 0x278   : > { %v1398_v46 = vsel %vm1334_vm3, %v2563_v45, 0.0 }
 0x279   : > { %1402 = vadd.xlane.f32.xlu0 %v1401_v25  ;;  %1399 = vadd.xlane.f32.xlu1 %v1398_v46 }
 0x27b   : > { %v2927_v47 = vpop.eup %2564 }
 0x27c   : > { %v1404_v48 = vsel %vm1334_vm3, %v2927_v47, 0.0 }
 0x27d   : > { %1405 = vadd.xlane.f32.xlu1 %v1404_v48 }
 0x2eb   : > { %v1385_v49 = vpop.xlane.xlu1 %1384 }
 0x2ec   : > { %2566 = vrcp.f32 %v1385_v49 }
 0x2f2   : > { %v1388_v50 = vpop.xlane.xlu1 %1387 }
 0x2f3   : > { %2568 = vrcp.f32 %v1388_v50 }
 0x2f9   : > { %v2567_v51 = vpop.eup %2566 }
 0x2fa   : > { %v1415_v52 = vmul.f32 %v2567_v51, %v2551_v19  ;;  %v1391_v53 = vpop.xlane.xlu0 %1390 }
 0x2fb   : > { %2570 = vrcp.f32 %v1391_v53 }
 0x2fc   : > { %2453 = vmatmul.mubr.msk.f32.vlgmr.msra.gmra.mxu1 %vm1423_vm4, %v1415_v52  ;;  %2008 = vst.msk [vmem:[#allocation3] sm:$0x1] %vm1334_vm3, %v1415_v52 }
 0x2fd   : > { %2461 = vmatpush3.msra.mxu1 %v2805_v13  ;;  %2462 = vmatprep.mubr.msk.f32.mxu1 %vm2645_vm0, %v2644_v3 }
 0x2fe   : > { %2470 = vmatprep.subr.mxu1 %v2644_v3  ;;  %v1397_v54 = vpop.xlane.xlu0 %1396  ;;  %v1394_v55 = vpop.xlane.xlu1 %1393 }
 0x2ff   : > { %2572 = vrcp.f32 %v1397_v54 }
 0x300   : > { %v2569_v56 = vpop.eup %2568  ;;  %2574 = vrcp.f32 %v1394_v55 }
 0x301   : > { %v1416_v57 = vmul.f32 %v2569_v56, %v2553_v33 }
 0x302   : > { %v1403_v58 = vpop.xlane.xlu0 %1402  ;;  %v1400_v59 = vpop.xlane.xlu1 %1399 }
 0x303   : > { %2576 = vrcp.f32 %v1403_v58  ;;  %2458 = vmatmul.mubr.msk.f32.vlgmr.msra.gmra.mxu0 %vm1423_vm4, %v1416_v57  ;;  %2009 = vst.msk [vmem:[#allocation3 + $0x1] sm:$0x1] %vm1334_vm3, %v1416_v57  ;;  %v2016_v9 = vld [vmem:[#allocation3] sm:$0x1] }
 0x304   : > { %2578 = vrcp.f32 %v1400_v59  ;;  %2466 = vmatpush3.msra.mxu0 %v2817_v14  ;;  %2467 = vmatprep.mubr.msk.f32.mxu0 %vm2645_vm0, %v2644_v3 }
 0x305   : > { %2475 = vmatprep.subr.mxu0 %v2644_v3 }
 0x306   : > { %v1406_v13 = vpop.xlane.xlu1 %1405 }
 0x307   : > { %2580 = vrcp.f32 %v1406_v13 }
 0x308   : > { %v2571_v60 = vpop.eup %2570 }
 0x309   : > { %v1417_v61 = vmul.f32 %v2571_v60, %v2555_v39 }
 0x30a   : > { %v2017_v6 = vld [vmem:[#allocation3 + $0x1] sm:$0x1] }
 0x30b   : > { %2463 = vmatmul.mubr.msk.f32.vlgmr.msra.gmra.mxu1 %vm1423_vm4, %v1417_v61  ;;  %2010 = vst.msk [vmem:[#allocation3 + $0x2] sm:$0x1] %vm1334_vm3, %v1417_v61  ;;  %v2032_v10 = vcombine.low %v2016_v9, %v2017_v6 }
 0x30c   : > { %v2573_v62 = vpop.eup %2572  ;;  %2471 = vmatpush3.msra.mxu1 %v2819_v15  ;;  %2472 = vmatprep.mubr.msk.f32.mxu1 %vm2645_vm0, %v2644_v3 }
 0x30d   : > { %v2575_v14 = vpop.eup %2574  ;;  %v1419_v63 = vmul.f32 %v2573_v62, %v2557_v41  ;;  %2480 = vmatprep.subr.mxu1 %v2644_v3  ;;  %v2042_v23 = vrot.slane %v2032_v10, %v2845_v27 }
 0x30e   : > { %v1418_v0 = vmul.f32 %v2575_v14, %v2559_v12 }
 0x30f   : > { %2473 = vmatmul.mubr.msk.f32.vlgmr.msra.gmra.mxu1 %vm1423_vm4, %v1419_v63  ;;  %2012 = vst.msk [vmem:[#allocation3 + $0x4] sm:$0x1] %vm1334_vm3, %v1419_v63 }
 0x310   : > { %v2577_v1 = vpop.eup %2576  ;;  %2468 = vmatmul.mubr.msk.f32.vlgmr.msra.gmra.mxu0 %vm1423_vm4, %v1418_v0  ;;  %2011 = vst.msk [vmem:[#allocation3 + $0x3] sm:$0x1] %vm1334_vm3, %v1418_v0  ;;  %2481 = vmatpush3.msra.mxu1 %v2827_v17 }
 0x311   : > { %v2579_v15 = vpop.eup %2578  ;;  %2476 = vmatpush3.msra.mxu0 %v2825_v16  ;;  %2477 = vmatprep.mubr.msk.f32.mxu0 %vm2645_vm0, %v2644_v3  ;;  %v1421_v2 = vmul.f32 %v2577_v1, %v2561_v44 }
 0x312   : > { %2482 = vmatprep.mubr.msk.f32.mxu1 %vm2645_vm0, %v2644_v3  ;;  %v1420_v4 = vmul.f32 %v2579_v15, %v2563_v45  ;;  %2485 = vmatprep.subr.mxu0 %v2644_v3  ;;  %v2018_v7 = vld [vmem:[#allocation3 + $0x2] sm:$0x1] }
 0x313   : > { %2483 = vmatmul.mubr.msk.f32.vlgmr.msra.gmra.mxu1 %vm1423_vm4, %v1421_v2  ;;  %2014 = vst.msk [vmem:[#allocation3 + $0x6] sm:$0x1] %vm1334_vm3, %v1421_v2 }
 0x314   : > { %v2581_v5 = vpop.eup %2580  ;;  %2478 = vmatmul.mubr.msk.f32.vlgmr.msra.gmra.mxu0 %vm1423_vm4, %v1420_v4  ;;  %2013 = vst.msk [vmem:[#allocation3 + $0x5] sm:$0x1] %vm1334_vm3, %v1420_v4 }
 0x315   : > { %2486 = vmatpush3.msra.mxu0 %v2833_v18  ;;  %2487 = vmatprep.mubr.msk.f32.mxu0 %vm2645_vm0, %v2644_v3  ;;  %v1422_v16 = vmul.f32 %v2581_v5, %v2927_v47 }
 0x316   : > { %v2020_v20 = vld [vmem:[#allocation3 + $0x4] sm:$0x1] }
 0x317   : > { %v2019_v17 = vld [vmem:[#allocation3 + $0x3] sm:$0x1]  ;;  %2015 = vst.msk [vmem:[#allocation3 + $0x7] sm:$0x1] %vm1334_vm3, %v1422_v16 }
 0x318   : > { %2488 = vmatmul.mubr.msk.f32.vlgmr.msra.gmra.mxu0 %vm1423_vm4, %v1422_v16  ;;  %v2033_v8 = vcombine.low %v2018_v7, %v2019_v17 }
 0x31a   : > { %v2049_v18 = vrot.slane %v2033_v8, %v2845_v27  ;;  %v2022_v22 = vld [vmem:[#allocation3 + $0x6] sm:$0x1] }
 0x31b   : > { %v2021_v19 = vld [vmem:[#allocation3 + $0x5] sm:$0x1] }
 0x31c   : > { %v2034_v21 = vcombine.low %v2020_v20, %v2021_v19  ;;  %v2064_v26 = vcombine.low %v2042_v23, %v2049_v18 }
 0x31e   : > { %v2023_v3 = vld [vmem:[#allocation3 + $0x7] sm:$0x1]  ;;  %v2056_v28 = vrot.slane %v2034_v21, %v2845_v27  ;;  %v2072_v31 = vrot.slane %v2064_v26, %v2845_v27 }
 0x31f   : > { %v2035_v24 = vcombine.low %v2022_v22, %v2023_v3 }
 0x321   : > { %v2063_v29 = vrot.slane %v2035_v24, %v2845_v27 }
 0x323   : > { %v2065_v30 = vcombine.low %v2056_v28, %v2063_v29 }
 0x325   : > { %v2079_v32 = vrot.slane %v2065_v30, %v2845_v27 }
 0x327   : > { %v2080_v11 = vcombine.low %v2072_v31, %v2079_v32 }
 0x329   : > { %2082 = vst.msk [vmem:[%s362_s22] sm:$0xff] %vm1423_vm4, %v2080_v11 }
 0x3bc   : > { %v1493_v33 = vpop.f32.mrf.mxu1 }
 0x3bd   : > { %2083 = vst.msk [vmem:[#allocation2] sm:$0x1] %vm655_vm2, %v1493_v33 }
 0x3be   : > { %v2454_v34 = vpop.f32.mrf.mxu1 }
 0x3c3   : > { %v1566_v35 = vpop.f32.mrf.mxu0 }
 0x3c4   : > { %2084 = vst.msk [vmem:[#allocation2 + $0x1] sm:$0x1] %vm655_vm2, %v1566_v35  ;;  %v2091_v51 = vld [vmem:[#allocation2] sm:$0x1] }
 0x3c5   : > { %v2459_v36 = vpop.f32.mrf.mxu0 }
 0x3cb   : > { %v1639_v37 = vpop.f32.mrf.mxu1  ;;  %v2092_v48 = vld [vmem:[#allocation2 + $0x1] sm:$0x1] }
 0x3cc   : > { %2085 = vst.msk [vmem:[#allocation2 + $0x2] sm:$0x1] %vm655_vm2, %v1639_v37  ;;  %v2107_v53 = vcombine.low %v2091_v51, %v2092_v48 }
 0x3cd   : > { %v2464_v38 = vpop.f32.mrf.mxu1 }
 0x3ce   : > { %v2117_v13 = vrot.slane %v2107_v53, %v2845_v27 }
 0x3cf   : > { %v1785_v39 = vpop.f32.mrf.mxu1 }
 0x3d0   : > { %v1712_v40 = vpop.f32.mrf.mxu0  ;;  %2087 = vst.msk [vmem:[#allocation2 + $0x4] sm:$0x1] %vm655_vm2, %v1785_v39 }
 0x3d1   : > { %2086 = vst.msk [vmem:[#allocation2 + $0x3] sm:$0x1] %vm655_vm2, %v1712_v40  ;;  %v2474_v41 = vpop.f32.mrf.mxu1 }
 0x3d2   : > { %v2469_v12 = vpop.f32.mrf.mxu0 }
 0x3d3   : > { %v1931_v42 = vpop.f32.mrf.mxu1  ;;  %v2093_v49 = vld [vmem:[#allocation2 + $0x2] sm:$0x1] }
 0x3d4   : > { %v1858_v43 = vpop.f32.mrf.mxu0  ;;  %2089 = vst.msk [vmem:[#allocation2 + $0x6] sm:$0x1] %vm655_vm2, %v1931_v42 }
 0x3d5   : > { %2088 = vst.msk [vmem:[#allocation2 + $0x5] sm:$0x1] %vm655_vm2, %v1858_v43  ;;  %v2484_v44 = vpop.f32.mrf.mxu1 }
 0x3d6   : > { %v2479_v45 = vpop.f32.mrf.mxu0 }
 0x3d7   : > { %v2095_v54 = vld [vmem:[#allocation2 + $0x4] sm:$0x1] }
 0x3d8   : > { %v2004_v25 = vpop.f32.mrf.mxu0  ;;  %v2094_v46 = vld [vmem:[#allocation2 + $0x3] sm:$0x1] }
 0x3d9   : > { %2090 = vst.msk [vmem:[#allocation2 + $0x7] sm:$0x1] %vm655_vm2, %v2004_v25  ;;  %v2108_v50 = vcombine.low %v2093_v49, %v2094_v46 }
 0x3da   : > { %v2489_v47 = vpop.f32.mrf.mxu0 }
 0x3db   : > { %v2124_v56 = vrot.slane %v2108_v50, %v2845_v27  ;;  %v2097_v57 = vld [vmem:[#allocation2 + $0x6] sm:$0x1] }
 0x3dc   : > { %v2096_v52 = vld [vmem:[#allocation2 + $0x5] sm:$0x1] }
 0x3dd   : > { %v2109_v55 = vcombine.low %v2095_v54, %v2096_v52  ;;  %v2139_v62 = vcombine.low %v2117_v13, %v2124_v56 }
 0x3df   : > { %v2131_v60 = vrot.slane %v2109_v55, %v2845_v27  ;;  %v2147_v63 = vrot.slane %v2139_v62, %v2845_v27 }
 0x3e0   : > { %v2098_v58 = vld [vmem:[#allocation2 + $0x7] sm:$0x1] }
 0x3e1   : > { %v2110_v59 = vcombine.low %v2097_v57, %v2098_v58 }
 0x3e3   : > { %v2138_v61 = vrot.slane %v2110_v59, %v2845_v27 }
 0x3e5   : > { %v2140_v14 = vcombine.low %v2131_v60, %v2138_v61 }
 0x3e7   : > { %v2154_v0 = vrot.slane %v2140_v14, %v2845_v27 }
 0x3e9   : > { %v2155_v1 = vcombine.low %v2147_v63, %v2154_v0 }
 0x3eb   : > { %2157 = vst.msk [vmem:[%s342_s26] sm:$0xff] %vm375_vm1, %v2155_v1 }
 0x3ec   : > { %2595 = shalt.err (!%p2592_p4)
}
 0x3ed   : > { %s2596_s22 = scalar_lea.hbm %s2174_s28, 128  ;;  %s2600_s25 = scalar_lea.hbm %s3039_s8, 256 }
 0x3ee   : > { %p2597_p7 = scmp.ne.s32.totalorder %s2174_s28, %s2596_s22  ;;  %p2601_p10 = scmp.lt.s32.totalorder %s2174_s28, %s3039_s8 }
 0x3ef   : > { %p2602_p11 = scmp.lt.s32.totalorder %s2600_s25, %s2596_s22 }
 0x3f0   : > { %p2598_p8 = pnand %p2597_p7, %p2740_p5 }
 0x3f1   : > { %p2603_p12 = por %p2602_p11, %p2601_p10 }
 0x3f2   : > { %p2599_p9 = pneg %p2598_p8 }
 0x3f4   : > { %p2604_p13 = pnand %p2603_p12, %p2599_p9 }
 0x3f6   : > { %2607 = shalt.err (!%p2604_p13)
}
 0x3f7   : > { %2490 = dma.vmem_to_hbm [thread:$0]  (%p2740_p5), %s2177_s30, 128, %s2174_s28, %s2159_s29  }
 0x3f8 PF: > { %p2496_p0 = scmp.ge.s32.totalorder %s2642_s14, 2  ;;  %s2191_s27 = sand.u32 1, %s2630_s11  }
 0x3f9   : > { %s2192_s10 = scalar_lea.sflag [#allocation6], %s2191_s27 }
 0x3fa   : > { %p2493_p1 = pnand %p2496_p0, %p2744_p6 }
 0x3fc   : > { %p2494_p2 = pneg %p2493_p1 }
 0x3fe   : > { %2625 = dma.done.wait (%p2494_p2), %s2192_s10, 128  }
 0x3ff   : > { %2627 = vsyncadd (%p2494_p2), %s2192_s10, 4294967168  ;;  %p22_p3 = scmp.ge.s32.totalorder %s2727_s16, 4   ;;  %s3044_s11 = smov %s2634_s12 }
 0x400   : > { %s3045_s12 = smov %s2638_s13  ;;  %s3046_s13 = smov %s2738_s19 }
 0x401   : > { %s3047_s14 = smov %s2727_s16  ;;  %24 = sbr.rel (!%p22_p3) target bundleno = 6 (0x6), region = 102 }
 0x406   :  { %2204 = vsyncpa [#allocation6], 1 }
 0x407   :  { %2206 = vsyncpa [#allocation6 + $0x1], 1 }

</bundles_post_ra>
